<compile_context>
chip_gen: v6e
topology: v6e:2x2x1
jax: 0.10.0
libtpu: 0.0.40
codegen_flags: <defaults>
</compile_context>

<pallas_src>
import math

import jax
import jax.numpy as jnp
from jax.experimental import pallas as pl
from jax.experimental.pallas import tpu as pltpu

# ---------------- configuration (small, consistent with the module) ----------
BATCH = 2
SEQ = 8
NUM_HIDDENS = 32          # key_size = query_size = value_size = num_hiddens
NUM_HEADS = 4
FFN_NUM_HIDDENS = 64
HEAD_DIM = NUM_HIDDENS // NUM_HEADS
LN_EPS = 1e-5
NEG_INF = -1e6            # d2l masked_softmax fill value


def _round_up(n, m):
    return ((n + m - 1) // m) * m


H_PAD = _round_up(NUM_HIDDENS, 128)        # lane-dense hidden width
F_PAD = _round_up(FFN_NUM_HIDDENS, 128)    # lane-dense FFN width
VEC_W = max(H_PAD, F_PAD)


def _make_kernel(B, S, H, NH, Hp, Fp):
    """Kernel factory: true (unpadded) dims are baked in as Python constants."""
    NHS = NH * S
    inv_h = 1.0 / float(H)

    def kernel(x_ref, wqkv_ref, wo_ref, w1_ref, w2_ref, vec_ref, cm_ref,
               bias_ref, o_ref):
        x = x_ref[...]                                        # (B*S, Hp) f32
        xb = x.astype(jnp.bfloat16)

        # ---- fused QKV projection (1/sqrt(head_dim) folded into W_q cols) ----
        qkv = jnp.dot(xb, wqkv_ref[...],
                      preferred_element_type=jnp.float32)     # (B*S, 3*Hp)
        qkv3 = qkv.reshape(B, S, 3 * Hp)
        q3 = qkv3[:, :, :Hp]                                  # 128-aligned slices
        k3 = qkv3[:, :, Hp:2 * Hp]
        v3 = qkv3[:, :, 2 * Hp:]

        # Static head-block mask, precomputed in the wrapper: (NH*S, Hp) 0/1.
        cmb = jnp.broadcast_to(cm_ref[...], (B, NHS, Hp))

        # Head-block-expanded keys; fused [values | head-mask] PV operand.
        kexp = (jnp.concatenate([k3] * NH, axis=1) * cmb).astype(jnp.bfloat16)
        vc = jnp.concatenate(
            [jnp.concatenate([v3] * NH, axis=1) * cmb, cmb],
            axis=-1).astype(jnp.bfloat16)                     # (B, NH*S, 2*Hp)

        # ---- all-head scores in one batched matmul ----
        s = jnp.einsum('bqd,bkd->bqk', q3.astype(jnp.bfloat16), kexp,
                       preferred_element_type=jnp.float32)    # (B, S, NH*S)
        s = s + bias_ref[...]                  # additive -1e6 key-validity mask
        # NOTE: shared (stacked-row) max, not per-head; it cancels between the
        # numerator and the per-head denominator below.  Fine at these
        # magnitudes; at real scales use a per-head max or guard the recip.
        s = s - jnp.max(s, axis=-1, keepdims=True)
        p = jnp.exp(s).astype(jnp.bfloat16)
        # TODO(synk): training-mode dropout on attention weights not implemented.

        # ---- fused PV + per-head softmax denominator in ONE matmul ----
        r = jnp.einsum('bqk,bkd->bqd', p, vc,
                       preferred_element_type=jnp.float32)    # (B, S, 2*Hp)
        ctx_un = r[:, :, :Hp]
        denom = jnp.maximum(r[:, :, Hp:], 1e-12)   # padded lanes have denom 0
        ctx = (ctx_un * pl.reciprocal(denom, approx=True)).reshape(B * S, Hp)

        attn = jnp.dot(ctx.astype(jnp.bfloat16), wo_ref[...],
                       preferred_element_type=jnp.float32)    # (B*S, Hp)

        # ---- packed LayerNorm / FFN-bias vectors (zero in padded lanes) ----
        g1 = vec_ref[0:1, :Hp]
        b1 = vec_ref[1:2, :Hp]
        g2 = vec_ref[2:3, :Hp]
        b2 = vec_ref[3:4, :Hp]
        bf2 = vec_ref[4:5, :Hp]
        bf1 = vec_ref[5:6, :Fp]

        # ---- AddNorm 1 : LayerNorm(dropout(attn) + x), eval-mode dropout ----
        # One-pass moments (sum & sum-of-squares).  Padded lanes of y are zero,
        # so dividing by the true H is exact.
        y = x + attn
        mu = jnp.sum(y, axis=-1, keepdims=True) * inv_h
        var = jnp.sum(y * y, axis=-1, keepdims=True) * inv_h - mu * mu
        yn = (y - mu) * jax.lax.rsqrt(var + LN_EPS) * g1 + b1

        # ---- PositionWiseFFN : dense2(relu(dense1(yn))) ----
        h1 = jnp.dot(yn.astype(jnp.bfloat16), w1_ref[...],
                     preferred_element_type=jnp.float32) + bf1
        h1 = jnp.maximum(h1, 0.0)
        ff = jnp.dot(h1.astype(jnp.bfloat16), w2_ref[...],
                     preferred_element_type=jnp.float32) + bf2

        # ---- AddNorm 2 : LayerNorm(dropout(ff) + yn) ----
        z = yn + ff
        mu2 = jnp.sum(z, axis=-1, keepdims=True) * inv_h
        var2 = jnp.sum(z * z, axis=-1, keepdims=True) * inv_h - mu2 * mu2
        o_ref[...] = (z - mu2) * jax.lax.rsqrt(var2 + LN_EPS) * g2 + b2

    return kernel


def prepare_params(params):
    """One-time weight / layout prep, hoisted out of the per-call path."""
    H, F = NUM_HIDDENS, FFN_NUM_HIDDENS
    Hp, Fp = H_PAD, F_PAD

    def pad2(w, rows, cols):
        return jnp.pad(w, ((0, rows - w.shape[0]), (0, cols - w.shape[1])))

    # Fuse W_q|W_k|W_v; fold 1/sqrt(head_dim) into the W_q columns; pad + bf16.
    wq = params["wq"] * (1.0 / math.sqrt(HEAD_DIM))
    wqkv = jnp.concatenate([pad2(wq, Hp, Hp),
                            pad2(params["wk"], Hp, Hp),
                            pad2(params["wv"], Hp, Hp)], axis=1)

    padr = lambda v: jnp.pad(v, ((0, 0), (0, VEC_W - v.shape[1])))
    vec_pack = jnp.concatenate(
        [padr(params["g1"]), padr(params["b1"]), padr(params["g2"]),
         padr(params["b2"]), padr(params["bf2"]), padr(params["bf1"]),
         jnp.zeros((2, VEC_W), jnp.float32)], axis=0)          # (8, VEC_W) f32

    # Static head-block mask: cm[c, r] = 1 iff stacked key column c belongs to
    # the same head as feature column r (c // S == r // HEAD_DIM, r < H).
    NHS = NUM_HEADS * SEQ
    c_id = jnp.arange(NHS, dtype=jnp.int32)[:, None]
    r_id = jnp.arange(Hp, dtype=jnp.int32)[None, :]
    cm = (((c_id // SEQ) == (r_id // HEAD_DIM)) & (r_id < H)).astype(jnp.float32)

    return {
        "wqkv": wqkv.astype(jnp.bfloat16),                     # (Hp, 3*Hp)
        "wo": pad2(params["wo"], Hp, Hp).astype(jnp.bfloat16),
        "w1": pad2(params["w1"], Hp, Fp).astype(jnp.bfloat16),
        "w2": pad2(params["w2"], Fp, Hp).astype(jnp.bfloat16),
        "vec": vec_pack,
        "cm": cm,
    }


def encoder_block(x, valid_lens, prep):
    """x: (B, S, H) f32, valid_lens: (B,) int32, prep: prepare_params(params)."""
    B, S, H = x.shape
    Hp, Fp = H_PAD, F_PAD
    NH = NUM_HEADS
    NHS = NH * S
    BS = B * S

    # Per-call prep: pad the activation slab, build the additive key-validity
    # bias tiled across heads: (B, 1, NH*S).
    x2 = jnp.pad(x.reshape(BS, H), ((0, 0), (0, Hp - H)))
    key_ids = jnp.arange(S, dtype=jnp.int32)[None, :]
    bias = jnp.where(key_ids < valid_lens[:, None], 0.0, NEG_INF)
    bias = jnp.tile(bias.astype(jnp.float32), (1, NH))[:, None, :]

    kernel = _make_kernel(B, S, H, NH, Hp, Fp)

    operands = (x2, prep["wqkv"], prep["wo"], prep["w1"], prep["w2"],
                prep["vec"], prep["cm"], bias)
    flops = (2 * BS * Hp * 3 * Hp            # fused QKV
             + 2 * B * S * NHS * Hp          # scores
             + 2 * B * S * NHS * 2 * Hp      # fused PV + denominator
             + 2 * BS * Hp * Hp              # output projection
             + 2 * BS * Hp * Fp              # FFN dense1
             + 2 * BS * Fp * Hp)             # FFN dense2
    bytes_accessed = (sum(int(o.size) * o.dtype.itemsize for o in operands)
                      + BS * Hp * 4)

    vmem = pl.BlockSpec(memory_space=pltpu.MemorySpace.VMEM)
    out = pl.pallas_call(
        kernel,
        out_shape=jax.ShapeDtypeStruct((BS, Hp), jnp.float32),
        in_specs=[vmem] * len(operands),
        out_specs=vmem,
        cost_estimate=pl.CostEstimate(
            flops=flops,
            transcendentals=B * S * NHS + 3 * BS,
            bytes_accessed=bytes_accessed),
    )(*operands)
    # Strip the lane padding back to the model width.
    return out.reshape(B, S, Hp)[:, :, :H]


def reference(x, valid_lens, params):
    """Pure-JAX f32 reference implementing the same eval-mode forward (d2l)."""
    B, S, H = x.shape
    q = x @ params["wq"]
    k = x @ params["wk"]
    v = x @ params["wv"]

    def split(t):  # (B,S,H) -> (B, heads, S, dh)
        return t.reshape(B, S, NUM_HEADS, HEAD_DIM).transpose(0, 2, 1, 3)

    qh, kh, vh = split(q), split(k), split(v)
    s = jnp.einsum("bhqd,bhkd->bhqk", qh, kh) / math.sqrt(HEAD_DIM)
    key_ids = jnp.arange(S)[None, None, None, :]
    keep = key_ids < valid_lens[:, None, None, None]
    s = jnp.where(keep, s, NEG_INF)
    p = jax.nn.softmax(s, axis=-1)
    o = jnp.einsum("bhqk,bhkd->bhqd", p, vh)
    o = o.transpose(0, 2, 1, 3).reshape(B, S, H) @ params["wo"]

    def ln(t, g, b):
        mu = t.mean(-1, keepdims=True)
        var = ((t - mu) ** 2).mean(-1, keepdims=True)
        return (t - mu) * jax.lax.rsqrt(var + LN_EPS) * g[0] + b[0]

    y = ln(x + o, params["g1"], params["b1"])
    ff = jnp.maximum(y @ params["w1"] + params["bf1"][0], 0.0) @ params["w2"] \
        + params["bf2"][0]
    return ln(y + ff, params["g2"], params["b2"])


def init_params(key):
    ks = jax.random.split(key, 8)
    H, F = NUM_HIDDENS, FFN_NUM_HIDDENS
    scale = 0.1
    return {
        "wq": scale * jax.random.normal(ks[0], (H, H), jnp.float32),
        "wk": scale * jax.random.normal(ks[1], (H, H), jnp.float32),
        "wv": scale * jax.random.normal(ks[2], (H, H), jnp.float32),
        "wo": scale * jax.random.normal(ks[3], (H, H), jnp.float32),
        "g1": jnp.ones((1, H), jnp.float32),
        "b1": jnp.zeros((1, H), jnp.float32),
        "w1": scale * jax.random.normal(ks[4], (H, F), jnp.float32),
        "bf1": scale * jax.random.normal(ks[5], (1, F), jnp.float32),
        "w2": scale * jax.random.normal(ks[6], (F, H), jnp.float32),
        "bf2": scale * jax.random.normal(ks[7], (1, H), jnp.float32),
        "g2": jnp.ones((1, H), jnp.float32),
        "b2": jnp.zeros((1, H), jnp.float32),
    }


if __name__ == "__main__":
    key = jax.random.PRNGKey(0)
    kx, kp = jax.random.split(key)
    x = jax.random.normal(kx, (BATCH, SEQ, NUM_HIDDENS), jnp.float32)
    valid_lens = jnp.array([5, 8], dtype=jnp.int32)
    params = init_params(kp)

    prep = prepare_params(params)          # one-time weight prep (hoisted)
    out = encoder_block(x, valid_lens, prep)
    out = jax.block_until_ready(out)

    ref = reference(x, valid_lens, params)
    assert out.shape == (BATCH, SEQ, NUM_HIDDENS)
    # Tolerance accounts for bf16 MXU operands (f32-accumulated) and the
    # approximate EUP reciprocal/rsqrt; any real bug (masking, head blocking,
    # padded-lane leakage, LayerNorm divisor) produces O(0.1 - 1) errors.
    assert jnp.allclose(out, ref, atol=5e-2, rtol=5e-2), "mismatch vs reference"
    print("KERNEL_OK")
</pallas_src>

<mosaic_0001>
module attributes {stable_mosaic.version = 11 : i64} {
  func.func @kernel(%arg0: memref<16x128xf32, #tpu.memory_space<vmem>>, %arg1: memref<128x384xbf16, #tpu.memory_space<vmem>>, %arg2: memref<128x128xbf16, #tpu.memory_space<vmem>>, %arg3: memref<128x128xbf16, #tpu.memory_space<vmem>>, %arg4: memref<128x128xbf16, #tpu.memory_space<vmem>>, %arg5: memref<8x128xf32, #tpu.memory_space<vmem>>, %arg6: memref<32x128xf32, #tpu.memory_space<vmem>>, %arg7: memref<2x1x32xf32, #tpu.memory_space<vmem>>, %arg8: memref<16x128xf32, #tpu.memory_space<vmem>>) attributes {dimension_semantics = [], scalar_prefetch = 0 : i64, scratch_operands = 0 : i64, tpu.core_type = #tpu.core_type<tc>} {
    %c0 = arith.constant 0 : index
    %c0_0 = arith.constant 0 : index
    %0 = vector.load %arg0[%c0, %c0_0] : memref<16x128xf32, #tpu.memory_space<vmem>>, vector<16x128xf32>
    %1 = arith.truncf %0 : vector<16x128xf32> to vector<16x128xbf16>
    %c0_1 = arith.constant 0 : index
    %c0_2 = arith.constant 0 : index
    %2 = vector.load %arg1[%c0_1, %c0_2] : memref<128x384xbf16, #tpu.memory_space<vmem>>, vector<128x384xbf16>
    %cst = arith.constant dense<0.000000e+00> : vector<16x384xf32>
    %3 = tpu.matmul %1, %2, %cst {dimension_numbers = #tpu.dot_dimension_numbers<[1], [0], [0], [1], [0, 0, 1, 1], [], []>} : vector<16x128xbf16>, vector<128x384xbf16>, vector<16x384xf32> -> vector<16x384xf32>
    %4 = vector.shape_cast %3 : vector<16x384xf32> to vector<2x8x384xf32>
    %5 = vector.extract_strided_slice %4 {offsets = [0, 0, 0], sizes = [2, 8, 128], strides = [1, 1, 1]} : vector<2x8x384xf32> to vector<2x8x128xf32>
    %6 = vector.extract_strided_slice %4 {offsets = [0, 0, 128], sizes = [2, 8, 128], strides = [1, 1, 1]} : vector<2x8x384xf32> to vector<2x8x128xf32>
    %7 = vector.extract_strided_slice %4 {offsets = [0, 0, 256], sizes = [2, 8, 128], strides = [1, 1, 1]} : vector<2x8x384xf32> to vector<2x8x128xf32>
    %c0_3 = arith.constant 0 : index
    %c0_4 = arith.constant 0 : index
    %8 = vector.load %arg6[%c0_3, %c0_4] : memref<32x128xf32, #tpu.memory_space<vmem>>, vector<32x128xf32>
    %9 = vector.shape_cast %8 : vector<32x128xf32> to vector<1x32x128xf32>
    %10 = vector.broadcast %9 : vector<1x32x128xf32> to vector<2x32x128xf32>
    %11 = tpu.concatenate %6, %6, %6, %6 in 1 : vector<2x8x128xf32>, vector<2x8x128xf32>, vector<2x8x128xf32>, vector<2x8x128xf32> -> vector<2x32x128xf32>
    %12 = arith.mulf %11, %10 : vector<2x32x128xf32>
    %13 = arith.truncf %12 : vector<2x32x128xf32> to vector<2x32x128xbf16>
    %14 = tpu.concatenate %7, %7, %7, %7 in 1 : vector<2x8x128xf32>, vector<2x8x128xf32>, vector<2x8x128xf32>, vector<2x8x128xf32> -> vector<2x32x128xf32>
    %15 = arith.mulf %14, %10 : vector<2x32x128xf32>
    %16 = tpu.concatenate %15, %10 in 2 : vector<2x32x128xf32>, vector<2x32x128xf32> -> vector<2x32x256xf32>
    %17 = arith.truncf %16 : vector<2x32x256xf32> to vector<2x32x256xbf16>
    %18 = arith.truncf %5 : vector<2x8x128xf32> to vector<2x8x128xbf16>
    "tpu.trace_start"() <{level = 10 : i32, message = "bqd,bkd->bqk"}> : () -> ()
    %cst_5 = arith.constant dense<0.000000e+00> : vector<2x8x32xf32>
    %19 = tpu.matmul %18, %13, %cst_5 {dimension_numbers = #tpu.dot_dimension_numbers<[2], [2], [1], [1], [0, 0, 0, 1, 1, 1], [0], [0]>} : vector<2x8x128xbf16>, vector<2x32x128xbf16>, vector<2x8x32xf32> -> vector<2x8x32xf32>
    "tpu.trace_stop"() : () -> ()
    %c0_6 = arith.constant 0 : index
    %c0_7 = arith.constant 0 : index
    %c0_8 = arith.constant 0 : index
    %20 = vector.load %arg7[%c0_6, %c0_7, %c0_8] : memref<2x1x32xf32, #tpu.memory_space<vmem>>, vector<2x1x32xf32>
    %21 = vector.broadcast %20 : vector<2x1x32xf32> to vector<2x8x32xf32>
    %22 = arith.addf %19, %21 : vector<2x8x32xf32>
    %cst_9 = arith.constant dense<0xFF800000> : vector<2x8xf32>
    %23 = vector.multi_reduction <maximumf>, %22, %cst_9 [2] : vector<2x8x32xf32> to vector<2x8xf32>
    %24 = vector.shape_cast %23 : vector<2x8xf32> to vector<2x8x1xf32>
    %25 = vector.broadcast %24 : vector<2x8x1xf32> to vector<2x8x32xf32>
    %26 = arith.subf %22, %25 : vector<2x8x32xf32>
    %27 = math.exp %26 : vector<2x8x32xf32>
    %28 = arith.truncf %27 : vector<2x8x32xf32> to vector<2x8x32xbf16>
    "tpu.trace_start"() <{level = 10 : i32, message = "bqk,bkd->bqd"}> : () -> ()
    %cst_10 = arith.constant dense<0.000000e+00> : vector<2x8x256xf32>
    %29 = tpu.matmul %28, %17, %cst_10 {dimension_numbers = #tpu.dot_dimension_numbers<[2], [1], [1], [2], [0, 0, 0, 1, 1, 2], [0], [0]>} : vector<2x8x32xbf16>, vector<2x32x256xbf16>, vector<2x8x256xf32> -> vector<2x8x256xf32>
    "tpu.trace_stop"() : () -> ()
    %30 = vector.extract_strided_slice %29 {offsets = [0, 0, 0], sizes = [2, 8, 128], strides = [1, 1, 1]} : vector<2x8x256xf32> to vector<2x8x128xf32>
    %31 = vector.extract_strided_slice %29 {offsets = [0, 0, 128], sizes = [2, 8, 128], strides = [1, 1, 1]} : vector<2x8x256xf32> to vector<2x8x128xf32>
    %cst_11 = arith.constant 9.99999996E-13 : f32
    %32 = vector.broadcast %cst_11 : f32 to vector<2x8x128xf32>
    %33 = arith.maximumf %31, %32 : vector<2x8x128xf32>
    %34 = tpu.reciprocal %33 {approx = true} : vector<2x8x128xf32> -> vector<2x8x128xf32>
    %35 = arith.mulf %30, %34 : vector<2x8x128xf32>
    %36 = vector.shape_cast %35 : vector<2x8x128xf32> to vector<16x128xf32>
    %37 = arith.truncf %36 : vector<16x128xf32> to vector<16x128xbf16>
    %c0_12 = arith.constant 0 : index
    %c0_13 = arith.constant 0 : index
    %38 = vector.load %arg2[%c0_12, %c0_13] : memref<128x128xbf16, #tpu.memory_space<vmem>>, vector<128x128xbf16>
    %cst_14 = arith.constant dense<0.000000e+00> : vector<16x128xf32>
    %39 = tpu.matmul %37, %38, %cst_14 {dimension_numbers = #tpu.dot_dimension_numbers<[1], [0], [0], [1], [0, 0, 1, 1], [], []>} : vector<16x128xbf16>, vector<128x128xbf16>, vector<16x128xf32> -> vector<16x128xf32>
    %c0_15 = arith.constant 0 : index
    %c0_16 = arith.constant 0 : index
    %40 = vector.load %arg5[%c0_15, %c0_16] : memref<8x128xf32, #tpu.memory_space<vmem>>, vector<1x128xf32>
    %c1 = arith.constant 1 : index
    %c0_17 = arith.constant 0 : index
    %41 = vector.load %arg5[%c1, %c0_17] : memref<8x128xf32, #tpu.memory_space<vmem>>, vector<1x128xf32>
    %c2 = arith.constant 2 : index
    %c0_18 = arith.constant 0 : index
    %42 = vector.load %arg5[%c2, %c0_18] : memref<8x128xf32, #tpu.memory_space<vmem>>, vector<1x128xf32>
    %c3 = arith.constant 3 : index
    %c0_19 = arith.constant 0 : index
    %43 = vector.load %arg5[%c3, %c0_19] : memref<8x128xf32, #tpu.memory_space<vmem>>, vector<1x128xf32>
    %c4 = arith.constant 4 : index
    %c0_20 = arith.constant 0 : index
    %44 = vector.load %arg5[%c4, %c0_20] : memref<8x128xf32, #tpu.memory_space<vmem>>, vector<1x128xf32>
    %c5 = arith.constant 5 : index
    %c0_21 = arith.constant 0 : index
    %45 = vector.load %arg5[%c5, %c0_21] : memref<8x128xf32, #tpu.memory_space<vmem>>, vector<1x128xf32>
    %46 = arith.addf %0, %39 : vector<16x128xf32>
    %cst_22 = arith.constant dense<0.000000e+00> : vector<16xf32>
    %47 = vector.multi_reduction <add>, %46, %cst_22 [1] : vector<16x128xf32> to vector<16xf32>
    %48 = vector.shape_cast %47 : vector<16xf32> to vector<16x1xf32>
    %cst_23 = arith.constant 3.125000e-02 : f32
    %49 = vector.broadcast %cst_23 : f32 to vector<16x1xf32>
    %50 = arith.mulf %48, %49 : vector<16x1xf32>
    %51 = arith.mulf %46, %46 : vector<16x128xf32>
    %cst_24 = arith.constant dense<0.000000e+00> : vector<16xf32>
    %52 = vector.multi_reduction <add>, %51, %cst_24 [1] : vector<16x128xf32> to vector<16xf32>
    %53 = vector.shape_cast %52 : vector<16xf32> to vector<16x1xf32>
    %cst_25 = arith.constant 3.125000e-02 : f32
    %54 = vector.broadcast %cst_25 : f32 to vector<16x1xf32>
    %55 = arith.mulf %53, %54 : vector<16x1xf32>
    %56 = arith.mulf %50, %50 : vector<16x1xf32>
    %57 = arith.subf %55, %56 : vector<16x1xf32>
    %58 = vector.broadcast %50 : vector<16x1xf32> to vector<16x128xf32>
    %59 = arith.subf %46, %58 : vector<16x128xf32>
    %cst_26 = arith.constant 9.99999974E-6 : f32
    %60 = vector.broadcast %cst_26 : f32 to vector<16x1xf32>
    %61 = arith.addf %57, %60 : vector<16x1xf32>
    %62 = math.rsqrt %61 : vector<16x1xf32>
    %63 = vector.broadcast %62 : vector<16x1xf32> to vector<16x128xf32>
    %64 = arith.mulf %59, %63 : vector<16x128xf32>
    %65 = vector.broadcast %40 : vector<1x128xf32> to vector<16x128xf32>
    %66 = arith.mulf %64, %65 : vector<16x128xf32>
    %67 = vector.broadcast %41 : vector<1x128xf32> to vector<16x128xf32>
    %68 = arith.addf %66, %67 : vector<16x128xf32>
    %69 = arith.truncf %68 : vector<16x128xf32> to vector<16x128xbf16>
    %c0_27 = arith.constant 0 : index
    %c0_28 = arith.constant 0 : index
    %70 = vector.load %arg3[%c0_27, %c0_28] : memref<128x128xbf16, #tpu.memory_space<vmem>>, vector<128x128xbf16>
    %cst_29 = arith.constant dense<0.000000e+00> : vector<16x128xf32>
    %71 = tpu.matmul %69, %70, %cst_29 {dimension_numbers = #tpu.dot_dimension_numbers<[1], [0], [0], [1], [0, 0, 1, 1], [], []>} : vector<16x128xbf16>, vector<128x128xbf16>, vector<16x128xf32> -> vector<16x128xf32>
    %72 = vector.broadcast %45 : vector<1x128xf32> to vector<16x128xf32>
    %73 = arith.addf %71, %72 : vector<16x128xf32>
    %cst_30 = arith.constant 0.000000e+00 : f32
    %74 = vector.broadcast %cst_30 : f32 to vector<16x128xf32>
    %75 = arith.maximumf %73, %74 : vector<16x128xf32>
    %76 = arith.truncf %75 : vector<16x128xf32> to vector<16x128xbf16>
    %c0_31 = arith.constant 0 : index
    %c0_32 = arith.constant 0 : index
    %77 = vector.load %arg4[%c0_31, %c0_32] : memref<128x128xbf16, #tpu.memory_space<vmem>>, vector<128x128xbf16>
    %cst_33 = arith.constant dense<0.000000e+00> : vector<16x128xf32>
    %78 = tpu.matmul %76, %77, %cst_33 {dimension_numbers = #tpu.dot_dimension_numbers<[1], [0], [0], [1], [0, 0, 1, 1], [], []>} : vector<16x128xbf16>, vector<128x128xbf16>, vector<16x128xf32> -> vector<16x128xf32>
    %79 = vector.broadcast %44 : vector<1x128xf32> to vector<16x128xf32>
    %80 = arith.addf %78, %79 : vector<16x128xf32>
    %81 = arith.addf %68, %80 : vector<16x128xf32>
    %cst_34 = arith.constant dense<0.000000e+00> : vector<16xf32>
    %82 = vector.multi_reduction <add>, %81, %cst_34 [1] : vector<16x128xf32> to vector<16xf32>
    %83 = vector.shape_cast %82 : vector<16xf32> to vector<16x1xf32>
    %cst_35 = arith.constant 3.125000e-02 : f32
    %84 = vector.broadcast %cst_35 : f32 to vector<16x1xf32>
    %85 = arith.mulf %83, %84 : vector<16x1xf32>
    %86 = arith.mulf %81, %81 : vector<16x128xf32>
    %cst_36 = arith.constant dense<0.000000e+00> : vector<16xf32>
    %87 = vector.multi_reduction <add>, %86, %cst_36 [1] : vector<16x128xf32> to vector<16xf32>
    %88 = vector.shape_cast %87 : vector<16xf32> to vector<16x1xf32>
    %cst_37 = arith.constant 3.125000e-02 : f32
    %89 = vector.broadcast %cst_37 : f32 to vector<16x1xf32>
    %90 = arith.mulf %88, %89 : vector<16x1xf32>
    %91 = arith.mulf %85, %85 : vector<16x1xf32>
    %92 = arith.subf %90, %91 : vector<16x1xf32>
    %93 = vector.broadcast %85 : vector<16x1xf32> to vector<16x128xf32>
    %94 = arith.subf %81, %93 : vector<16x128xf32>
    %cst_38 = arith.constant 9.99999974E-6 : f32
    %95 = vector.broadcast %cst_38 : f32 to vector<16x1xf32>
    %96 = arith.addf %92, %95 : vector<16x1xf32>
    %97 = math.rsqrt %96 : vector<16x1xf32>
    %98 = vector.broadcast %97 : vector<16x1xf32> to vector<16x128xf32>
    %99 = arith.mulf %94, %98 : vector<16x128xf32>
    %100 = vector.broadcast %42 : vector<1x128xf32> to vector<16x128xf32>
    %101 = arith.mulf %99, %100 : vector<16x128xf32>
    %102 = vector.broadcast %43 : vector<1x128xf32> to vector<16x128xf32>
    %103 = arith.addf %101, %102 : vector<16x128xf32>
    %c0_39 = arith.constant 0 : index
    %c0_40 = arith.constant 0 : index
    %104 = vector.load %arg8[%c0_39, %c0_40] : memref<16x128xf32, #tpu.memory_space<vmem>>, vector<16x128xf32>
    tpu.vector_store %arg8[%c0_39, %c0_40], %103 {strides = array<i32>} : memref<16x128xf32, #tpu.memory_space<vmem>>, vector<16x128xf32>,
    return
  }
}

</mosaic_0001>

<bundles_post_ra>
// kernel: tpu_custom_call.1
= control target key start
LH: loop header
LB: loop body
LE: loop exit
PB: predicated region body
PF: predicated region fallthrough
CT: control target
= control target key end

     0   :  { %13 = vsyncpa [#allocation3], 0  ;;  %s1664_s0 = inlined_call_operand.hbm [shape: f32[16,128], index: 0, kind: input, shape index: {}]   ;;  %s1665_s1 = inlined_call_operand.hbm [shape: bf16[128,384], index: 1, kind: input, shape index: {}]   ;;  %s1666_s2 = inlined_call_operand.hbm [shape: bf16[128,128], index: 2, kind: input, shape index: {}]   ;;  %s1667_s3 = inlined_call_operand.hbm [shape: bf16[128,128], index: 3, kind: input, shape index: {}]   ;;  %s1668_s4 = inlined_call_operand.hbm [shape: bf16[128,128], index: 4, kind: input, shape index: {}]   ;;  %s1669_s5 = inlined_call_operand.vmem [shape: f32[8,128], index: 5, kind: input, shape index: {}]   ;;  %s1670_s6 = inlined_call_operand.hbm [shape: f32[32,128], index: 6, kind: input, shape index: {}]   ;;  %s1671_s7 = inlined_call_operand.vmem [shape: f32[2,1,32], index: 7, kind: input, shape index: {}]   ;;  %s1672_s8 = inlined_call_operand.hbm [shape: f32[16,128], index: 8, kind: output, shape index: {}]  }
   0x1   :  { %14 = vsyncpa [#allocation6], 0 }
   0x2   :  { %15 = vsyncpa [#allocation9], 0 }
   0x3   :  { %16 = vsyncpa [#allocation12], 0 }
   0x4   :  { %17 = vsyncpa [#allocation4], 0  ;;  %s1465_s27 = smov [#allocation5]  }
   0x5   :  { %s35_s28 = sshll.u32 %s1465_s27, 4  ;;  %s36_s28 = int_to_ptr.vmem [resolvable:$true] %s35_s28 }
   0x6   :  { %s1323_s29 = scalar_lea.vmem %s36_s28, 3072  ;;  %p1328_p1 = scmp.lt.s32.totalorder %s36_s28, %s36_s28 }
   0x7   :  { %p1324_p0 = scmp.ne.s32.totalorder %s36_s28, %s1323_s29  ;;  %p1329_p2 = scmp.lt.s32.totalorder %s1323_s29, %s1323_s29 }
   0x9   :  { %p1330_p3 = por %p1329_p2, %p1328_p1 }
   0xb   :  { %p1331_p4 = pnand %p1330_p3, %p1324_p0 }
   0xd   :  { %1334 = shalt.err (!%p1331_p4)
}
   0xe   :  { %s1466_s30 = smov 192   ;;  %s1467_s9 = smov 12  }
   0xf   :  { %41 = dma.hbm_to_vmem [thread:$0]  %s1665_s1, 3072, %s36_s28, [#allocation6], %s1466_s30, %s1466_s30, %s1467_s9  }
  0x10   :  { %s1468_s12 = smov [#allocation8]   ;;  %s1469_s14 = smov [#allocation2]  }
  0x11   :  { %s59_s13 = sshll.u32 %s1468_s12, 4  ;;  %s23_s15 = sshll.u32 %s1469_s14, 4  ;;  %s60_s13 = int_to_ptr.vmem [resolvable:$true] %s59_s13  ;;  %s24_s15 = int_to_ptr.vmem [resolvable:$true] %s23_s15 }
  0x12   :  { %s1343_s16 = scalar_lea.vmem %s60_s13, 1024  ;;  %p1348_p6 = scmp.lt.s32.totalorder %s60_s13, %s60_s13 }
  0x13   :  { %p1344_p5 = scmp.ne.s32.totalorder %s60_s13, %s1343_s16  ;;  %p1349_p7 = scmp.lt.s32.totalorder %s1343_s16, %s1343_s16 }
  0x15   :  { %p1350_p8 = por %p1349_p7, %p1348_p6 }
  0x17   :  { %p1351_p9 = pnand %p1350_p8, %p1344_p5 }
  0x19   :  { %1354 = shalt.err (!%p1351_p9)
}
  0x1a   :  { %s1470_s17 = smov 64   ;;  %s1471_s18 = smov 4  }
  0x1b   :  { %65 = dma.hbm_to_vmem [thread:$0]  %s1667_s3, 1024, %s60_s13, [#allocation9], %s1470_s17, %s1470_s17, %s1471_s18  }
  0x1c   :  { %s1363_s1 = scalar_lea.vmem %s24_s15, 256  ;;  %p1368_p11 = scmp.lt.s32.totalorder %s24_s15, %s24_s15 }
  0x1d   :  { %p1364_p10 = scmp.ne.s32.totalorder %s24_s15, %s1363_s1  ;;  %p1369_p12 = scmp.lt.s32.totalorder %s1363_s1, %s1363_s1 }
  0x1f   :  { %p1370_p13 = por %p1369_p12, %p1368_p11 }
  0x21   :  { %p1371_p0 = pnand %p1370_p13, %p1364_p10 }
  0x23   :  { %1374 = shalt.err (!%p1371_p0)
}
  0x24   :  { %s1472_s21 = smov 128   ;;  %s1473_s22 = smov 8  }
  0x25   :  { %29 = dma.hbm_to_vmem [thread:$0]  %s1664_s0, 256, %s24_s15, [#allocation3], %s1472_s21, %s1472_s21, %s1473_s22  }
  0x26   :  { %s1474_s25 = smov [#allocation7]   ;;  %s1475_s3 = smov [#allocation10]  }
  0x27   :  { %s47_s26 = sshll.u32 %s1474_s25, 4  ;;  %s71_s27 = sshll.u32 %s1475_s3, 4  ;;  %s48_s26 = int_to_ptr.vmem [resolvable:$true] %s47_s26  ;;  %s72_s27 = int_to_ptr.vmem [resolvable:$true] %s71_s27 }
  0x28   :  { %s1383_s28 = scalar_lea.vmem %s48_s26, 1024  ;;  %p1388_p2 = scmp.lt.s32.totalorder %s48_s26, %s48_s26 }
  0x29   :  { %p1384_p1 = scmp.ne.s32.totalorder %s48_s26, %s1383_s28  ;;  %p1389_p3 = scmp.lt.s32.totalorder %s1383_s28, %s1383_s28 }
  0x2b   :  { %p1390_p4 = por %p1389_p3, %p1388_p2 }
  0x2d   :  { %p1391_p5 = pnand %p1390_p4, %p1384_p1 }
  0x2f   :  { %1394 = shalt.err (!%p1391_p5)
}
  0x30   :  { %53 = dma.hbm_to_vmem [thread:$0]  %s1666_s2, 1024, %s48_s26, [#allocation6], %s1470_s17, %s1470_s17, %s1471_s18  }
  0x31   :  { %s1403_s0 = scalar_lea.vmem %s72_s27, 1024  ;;  %p1408_p7 = scmp.lt.s32.totalorder %s72_s27, %s72_s27 }
  0x32   :  { %p1404_p6 = scmp.ne.s32.totalorder %s72_s27, %s1403_s0  ;;  %p1409_p8 = scmp.lt.s32.totalorder %s1403_s0, %s1403_s0 }
  0x34   :  { %p1410_p9 = por %p1409_p8, %p1408_p7 }
  0x36   :  { %p1411_p10 = pnand %p1410_p9, %p1404_p6 }
  0x38   :  { %1414 = shalt.err (!%p1411_p10)
}
  0x39   :  { %77 = dma.hbm_to_vmem [thread:$0]  %s1668_s4, 1024, %s72_s27, [#allocation9], %s1470_s17, %s1470_s17, %s1471_s18  }
  0x3a   :  { %s1476_s11 = smov [#allocation11]  }
  0x3b   :  { %s85_s12 = sshll.u32 %s1476_s11, 4  ;;  %s86_s12 = int_to_ptr.vmem [resolvable:$true] %s85_s12 }
  0x3c   :  { %s1423_s13 = scalar_lea.vmem %s86_s12, 512  ;;  %p1428_p12 = scmp.lt.s32.totalorder %s86_s12, %s86_s12 }
  0x3d   :  { %p1424_p11 = scmp.ne.s32.totalorder %s86_s12, %s1423_s13  ;;  %p1429_p13 = scmp.lt.s32.totalorder %s1423_s13, %s1423_s13 }
  0x3f   :  { %p1430_p0 = por %p1429_p13, %p1428_p12 }
  0x41   :  { %p1431_p1 = pnand %p1430_p0, %p1424_p11 }
  0x43   :  { %1434 = shalt.err (!%p1431_p1)
}
  0x44   :  { %91 = dma.hbm_to_vmem [thread:$0]  %s1670_s6, 512, %s86_s12, [#allocation12], %s1472_s21, %s1472_s21, %s1473_s22  }
  0x45   :  { %1455 = dma.done.wait [#allocation3], 256  }
  0x46   :  { %1456 = vsyncadd [#allocation3], 4294967040 }
  0x47   :  { %1457 = dma.done.wait [#allocation6], 4096  }
  0x48   :  { %1458 = vsyncadd [#allocation6], 4294963200 }
  0x49   :  { %1459 = dma.done.wait [#allocation9], 2048  }
  0x4a   :  { %1460 = vsyncadd [#allocation9], 4294965248 }
  0x4b   :  { %1461 = dma.done.wait [#allocation12], 512  }
  0x4c   :  { %1462 = vsyncadd [#allocation12], 4294966784  ;;  %v1477_v0 = vmov 0   ;;  %v1478_v1 = vmov 0.0   ;;  %vm1479_vm0 = vmmov 0   ;;  %v1566_v23 = vld [vmem:[#allocation2] sm:$0xff] }
  0x4d   :  { %308 = vmatprep.mubr.bf16.mxu0 %v1477_v0  ;;  %1131 = vmatprep.subr.bf16.mxu1 %v1478_v1  ;;  %v1243_v2 = vld [vmem:[#allocation5 + $0xac] ss:$12 sps:$4 sm:$0xff]   ;;  %v1245_v3 = vld [vmem:[#allocation5 + $0xa8] ss:$12 sps:$4 sm:$0xff]   ;;  %v1248_v5 = vld [vmem:[#allocation5 + $0x90] ss:$12 sps:$4 sm:$0xff]  }
  0x4e   :  { %1147 = vmatprep.mubr.msk.bf16.mxu1 %vm1479_vm0, %v1478_v1  ;;  %276 = vmatprep.subr.bf16.mxu0 %v1243_v2  ;;  %v1246_v4 = vld [vmem:[#allocation5 + $0x94] ss:$12 sps:$4 sm:$0xff]   ;;  %v1249_v6 = vld [vmem:[#allocation5 + $0x7c] ss:$12 sps:$4 sm:$0xff]   ;;  %v1251_v7 = vld [vmem:[#allocation5 + $0x78] ss:$12 sps:$4 sm:$0xff]  }
  0x4f   :  { %277 = vmatpush1.bf16.msra.mxu0 %v1245_v3  ;;  %v1252_v8 = vld [vmem:[#allocation5 + $0x64] ss:$12 sps:$4 sm:$0xff]   ;;  %v1254_v9 = vld [vmem:[#allocation5 + $0x60] ss:$12 sps:$4 sm:$0xff]   ;;  %v1257_v13 = vld [vmem:[#allocation5 + $0x48] ss:$12 sps:$4 sm:$0xff]  }
  0x50   :  { %278 = vmatprep.subr.bf16.mxu0 %v1246_v4  ;;  %v1255_v10 = vld [vmem:[#allocation5 + $0x4c] ss:$12 sps:$4 sm:$0xff]   ;;  %v1267_v11 = vld [vmem:[#allocation5 + $0xb0] ss:$12 sps:$4 sm:$0xff]   ;;  %v1258_v14 = vld [vmem:[#allocation5 + $0x34] ss:$12 sps:$4 sm:$0xff]  }
  0x51   :  { %1132 = vmatpush3.bf16.msra.mxu1 %v1267_v11  ;;  %v1268_v12 = vld [vmem:[#allocation5 + $0x98] ss:$12 sps:$4 sm:$0xff]   ;;  %v1260_v15 = vld [vmem:[#allocation5 + $0x30] ss:$12 sps:$4 sm:$0xff]   ;;  %v1269_v16 = vld [vmem:[#allocation5 + $0x80] ss:$12 sps:$4 sm:$0xff]  }
  0x52   :  { %1133 = vmatprep.subr.bf16.mxu1 %v1478_v1  ;;  %v1261_v17 = vld [vmem:[#allocation5 + $0x1c] ss:$12 sps:$4 sm:$0xff]   ;;  %v1263_v19 = vld [vmem:[#allocation5 + $0x18] ss:$12 sps:$4 sm:$0xff]   ;;  %v1266_v22 = vld [vmem:[#allocation5] ss:$12 sps:$4 sm:$0xff]  }
  0x53   :  { %279 = vmatpush1.bf16.msra.mxu0 %v1248_v5  ;;  %v1270_v18 = vld [vmem:[#allocation5 + $0x68] ss:$12 sps:$4 sm:$0xff]   ;;  %v1264_v20 = vld [vmem:[#allocation5 + $0x4] ss:$12 sps:$4 sm:$0xff]   ;;  %v1568_v24 = vld [vmem:[#allocation2 + $0x8] sm:$0xff]  ;;  %vm486_vm1 = vcmask 261120  }
  0x54   :  { %280 = vmatprep.subr.bf16.mxu0 %v1249_v6  ;;  %v1271_v21 = vld [vmem:[#allocation5 + $0x50] ss:$12 sps:$4 sm:$0xff]   ;;  %v1272_v25 = vld [vmem:[#allocation5 + $0x38] ss:$12 sps:$4 sm:$0xff]   ;;  %v115_v26 = vpack.c.bf16 %v1568_v24, %v1566_v23  ;;  %v1273_v27 = vld [vmem:[#allocation5 + $0x20] ss:$12 sps:$4 sm:$0xff]  }
  0x55   :  { %1134 = vmatpush3.bf16.msra.mxu1 %v1268_v12  ;;  %v1274_v28 = vld [vmem:[#allocation5 + $0x8] ss:$12 sps:$4 sm:$0xff]   ;;  %v363_v30 = vld [vmem:[#allocation11 + $0x18] sm:$0xff]  ;;  %v360_v37 = vld [vmem:[#allocation11] sm:$0xff]  ;;  %s1480_s28 = smov [#allocation13]  }
  0x56   :  { %1135 = vmatprep.subr.bf16.mxu1 %v1478_v1  ;;  %v362_v29 = vld [vmem:[#allocation11 + $0x10] sm:$0xff]  ;;  %v361_v38 = vld [vmem:[#allocation11 + $0x8] sm:$0xff]  ;;  %s1016_s29 = sshll.u32 %s1480_s28, 4  ;;  %s1017_s29 = int_to_ptr.vmem [resolvable:$true] %s1016_s29 }
  0x57   :  { %281 = vmatpush1.bf16.msra.mxu0 %v1251_v7  ;;  %v387_v31 = vpack.c.bf16 %v363_v30, %v362_v29  ;;  %v385_v51 = vpack.c.bf16 %v361_v38, %v360_v37  ;;  %v1055_v7 = vld [vmem:[%s1671_s7] ss:$0 sm:$0xff]  ;;  %s1435_s30 = scalar_lea.vmem %s1017_s29, 256  ;;  %p1440_p3 = scmp.lt.s32.totalorder %s1017_s29, %s1017_s29 }
  0x58   :  { %282 = vmatprep.subr.bf16.mxu0 %v1252_v8  ;;  %p1436_p2 = scmp.ne.s32.totalorder %s1017_s29, %s1435_s30  ;;  %p1441_p4 = scmp.lt.s32.totalorder %s1435_s30, %s1435_s30 }
  0x59   :  { %1136 = vmatpush3.bf16.msra.mxu1 %v1269_v16 }
  0x5a   :  { %1137 = vmatprep.subr.bf16.mxu1 %v1478_v1  ;;  %p1442_p5 = por %p1441_p4, %p1440_p3 }
  0x5b   :  { %283 = vmatpush1.bf16.msra.mxu0 %v1254_v9 }
  0x5c   :  { %284 = vmatprep.subr.bf16.mxu0 %v1255_v10  ;;  %p1443_p6 = pnand %p1442_p5, %p1436_p2 }
  0x5d   :  { %1138 = vmatpush3.bf16.msra.mxu1 %v1270_v18 }
  0x5e   :  { %1139 = vmatprep.subr.bf16.mxu1 %v1478_v1 }
  0x5f   :  { %285 = vmatpush1.bf16.msra.mxu0 %v1257_v13 }
  0x60   :  { %286 = vmatprep.subr.bf16.mxu0 %v1258_v14 }
  0x61   :  { %1140 = vmatpush3.bf16.msra.mxu1 %v1271_v21 }
  0x62   :  { %1141 = vmatprep.subr.bf16.mxu1 %v1478_v1 }
  0x63   :  { %287 = vmatpush1.bf16.msra.mxu0 %v1260_v15 }
  0x64   :  { %288 = vmatprep.subr.bf16.mxu0 %v1261_v17 }
  0x65   :  { %1142 = vmatpush3.bf16.msra.mxu1 %v1272_v25 }
  0x66   :  { %1143 = vmatprep.subr.bf16.mxu1 %v1478_v1 }
  0x67   :  { %289 = vmatpush1.bf16.msra.mxu0 %v1263_v19 }
  0x68   :  { %290 = vmatprep.subr.bf16.mxu0 %v1264_v20 }
  0x69   :  { %1144 = vmatpush3.bf16.msra.mxu1 %v1273_v27 }
  0x6a   :  { %1145 = vmatprep.subr.bf16.mxu1 %v1478_v1 }
  0x6b   :  { %291 = vmatpush1.bf16.msra.mxu0 %v1266_v22 }
  0x6c   :  { %516 = vmatprep.subr.bf16.mxu0 %v387_v31 }
  0x6d   :  { %1146 = vmatpush3.bf16.msra.mxu1 %v1274_v28 }
  0x6e   :  { %309 = vmatmul.mubr.bf16.vlgmr.msra.gmra.mxu0 %v115_v26  ;;  %1151 = vmatprep.subr.bf16.mxu1 %v1478_v1 }
  0x6f   :  { %536 = vmatprep.mubr.bf16.mxu0 %v1477_v0 }
  0x70   :  { %1148 = vmatmul.mubr.bf16.vlgmr.msra.gmra.mxu1 %v115_v26 }
  0x71   :  { %1155 = vmatprep.mubr.msk.bf16.mxu1 %vm1479_vm0, %v1478_v1 }
 0x12e   :  { %v310_v32 = vpop.f32.mrf.mxu0 }
 0x12f   :  { %v390_v57 = vpack.c.bf16 %v310_v32, %v310_v32  ;;  %v1275_v32 = vld [vmem:[#allocation7 + $0x38] sm:$0xff]  }
 0x130   :  { %v312_v33 = vpop.f32.mrf.mxu0  ;;  %v353_v42 = vpop.f32.mrf.mxu1 }
 0x131   :  { %v366_v34 = vmul.f32 %v362_v29, %v312_v33  ;;  %v367_v35 = vmul.f32 %v363_v30, %v312_v33  ;;  %v364_v39 = vmul.f32 %v360_v37, %v312_v33  ;;  %v365_v40 = vmul.f32 %v361_v38, %v312_v33  ;;  %v1276_v33 = vld [vmem:[#allocation7 + $0x30] sm:$0xff]  }
 0x132   :  { %v314_v41 = vpop.f32.mrf.mxu0  ;;  %v378_v43 = vmul.f32 %v362_v29, %v353_v42  ;;  %v379_v44 = vmul.f32 %v363_v30, %v353_v42  ;;  %v376_v46 = vmul.f32 %v360_v37, %v353_v42  ;;  %v377_v47 = vmul.f32 %v361_v38, %v353_v42  ;;  %v1149_v48 = vpop.f32.mrf.mxu1 }
 0x133   :  { %v373_v36 = vpack.c.bf16 %v367_v35, %v366_v34  ;;  %v372_v45 = vpack.c.bf16 %v365_v40, %v364_v39  ;;  %v391_v5 = vpack.c.bf16 %v314_v41, %v314_v41  ;;  %v1277_v34 = vld [vmem:[#allocation7 + $0x28] sm:$0xff]   ;;  %v1278_v35 = vld [vmem:[#allocation7 + $0x20] sm:$0xff]  }
 0x134   :  { %v316_v49 = vpop.f32.mrf.mxu0  ;;  %v386_v50 = vpack.c.bf16 %v379_v44, %v378_v43  ;;  %v356_v52 = vpop.f32.mrf.mxu1  ;;  %v384_v56 = vpack.c.bf16 %v377_v47, %v376_v46  ;;  %v1282_v39 = vld [vmem:[#allocation7] sm:$0xff]  }
 0x135   :  { %1152 = vmatpush3.bf16.xpose.msra.mxu1 %v373_v36  ;;  %v370_v53 = vmul.f32 %v362_v29, %v316_v49  ;;  %v371_v54 = vmul.f32 %v363_v30, %v316_v49  ;;  %v368_v59 = vmul.f32 %v360_v37, %v316_v49  ;;  %v369_v60 = vmul.f32 %v361_v38, %v316_v49  ;;  %v1279_v36 = vld [vmem:[#allocation7 + $0x18] sm:$0xff]  }
 0x136   :  { %1153 = vmatprep.subr.bf16.mxu1 %v1478_v1  ;;  %v1150_v55 = vpop.f32.mrf.mxu1  ;;  %517 = vmatpush1.bf16.msra.mxu0 %v386_v50  ;;  %v382_v62 = vmul.f32 %v362_v29, %v356_v52  ;;  %v383_v63 = vmul.f32 %v363_v30, %v356_v52  ;;  %v380_v2 = vmul.f32 %v360_v37, %v356_v52  ;;  %v1280_v37 = vld [vmem:[#allocation7 + $0x10] sm:$0xff]  }
 0x137   :  { %518 = vmatprep.subr.bf16.mxu0 %v385_v51  ;;  %v375_v58 = vpack.c.bf16 %v371_v54, %v370_v53  ;;  %v374_v61 = vpack.c.bf16 %v369_v60, %v368_v59  ;;  %v381_v3 = vmul.f32 %v361_v38, %v356_v52  ;;  %v1281_v38 = vld [vmem:[#allocation7 + $0x8] sm:$0xff]  }
 0x138   :  { %v389_v4 = vpack.c.bf16 %v383_v63, %v382_v62  ;;  %v1284_v63 = vld [vmem:[#allocation8 + $0x30] sm:$0xff]  }
 0x139   :  { %v388_v6 = vpack.c.bf16 %v381_v3, %v380_v2  ;;  %v1285_v2 = vld [vmem:[#allocation8 + $0x28] sm:$0xff]   ;;  %v1287_v3 = vld [vmem:[#allocation8 + $0x18] sm:$0xff]  }
 0x13a   :  { %519 = vmatpush1.bf16.msra.mxu0 %v384_v56 }
 0x13b   :  { %1167 = vmatprep.subr.bf16.mxu0 %v1478_v1 }
 0x13d   :  { %1154 = vmatpush3.bf16.xpose.msra.mxu1 %v372_v45 }
 0x13e   :  { %1159 = vmatprep.subr.bf16.mxu1 %v1478_v1 }
 0x144   :  { %1156 = vmatmul.mubr.bf16.vlgmr.msra.gmra.mxu1 %v390_v57 }
 0x145   :  { %1160 = vmatpush3.bf16.xpose.msra.mxu1 %v375_v58  ;;  %1163 = vmatprep.mubr.msk.bf16.mxu1 %vm1479_vm0, %v1478_v1 }
 0x146   :  { %1161 = vmatprep.subr.bf16.mxu1 %v1478_v1 }
 0x14d   :  { %1162 = vmatpush3.bf16.xpose.msra.mxu1 %v374_v61 }
 0x14e   :  { %560 = vmatprep.subr.bf16.mxu1 %v387_v31 }
 0x154   :  { %1164 = vmatmul.mubr.bf16.vlgmr.msra.gmra.mxu1 %v391_v5  ;;  %v1289_v5 = vld [vmem:[#allocation8 + $0x8] sm:$0xff]  }
 0x155   :  { %561 = vmatpush1.bf16.msra.mxu1 %v389_v4  ;;  %580 = vmatprep.mubr.bf16.mxu1 %v1477_v0  ;;  %v1056_v0 = vld [vmem:[%s1671_s7 + $0x1] ss:$0 sm:$0xff] }
 0x156   :  { %562 = vmatprep.subr.bf16.mxu1 %v385_v51  ;;  %v1288_v4 = vld [vmem:[#allocation8 + $0x10] sm:$0xff]  }
 0x159   :  { %563 = vmatpush1.bf16.msra.mxu1 %v388_v6  ;;  %v1290_v6 = vld [vmem:[#allocation8] sm:$0xff]  }
 0x15a   :  { %1187 = vmatprep.subr.bf16.mxu1 %v1478_v1 }
 0x204   :  { %v440_v8 = vpop.f32.mrf.mxu1 }
 0x205   :  { %v441_v9 = vadd.f32 %v1055_v7, %v440_v8  ;;  %v1291_v7 = vld [vmem:[#allocation10 + $0x38] sm:$0xff]   ;;  %v1292_v8 = vld [vmem:[#allocation10 + $0x30] sm:$0xff]  }
 0x206   :  { %v1157_v10 = vpop.f32.mrf.mxu1 }
 0x207   :  { %v487_v11 = vsel %vm486_vm1, %v441_v9, -inf  ;;  %v1294_v10 = vld [vmem:[#allocation10 + $0x20] sm:$0xff]  }
 0x208   :  { %488 = vmax.xlane.f32.xlu0 %v487_v11  ;;  %v443_v12 = vpop.f32.mrf.mxu1  ;;  %v1295_v11 = vld [vmem:[#allocation10 + $0x18] sm:$0xff]  }
 0x20a   :  { %v1158_v13 = vpop.f32.mrf.mxu1 }
 0x214   :  { %v480_v14 = vpop.f32.mrf.mxu1 }
 0x215   :  { %v481_v15 = vadd.f32 %v1056_v0, %v480_v14 }
 0x216   :  { %v1165_v16 = vpop.f32.mrf.mxu1 }
 0x217   :  { %v490_v17 = vsel %vm486_vm1, %v481_v15, -inf }
 0x218   :  { %491 = vmax.xlane.f32.xlu0 %v490_v17  ;;  %v483_v18 = vpop.f32.mrf.mxu1 }
 0x21a   :  { %v1166_v19 = vpop.f32.mrf.mxu1 }
 0x291   :  { %v489_v20 = vpop.xlane.xlu0 %488 }
 0x292   :  { %v493_v21 = vsub.f32 %v441_v9, %v489_v20  ;;  %v1293_v9 = vld [vmem:[#allocation10 + $0x28] sm:$0xff]  }
 0x294   :  { %v495_v22 = vmul.f32 1.442695, %v493_v21 }
 0x296   :  { %1299 = vpow2.f32 %v495_v22 }
 0x2a1   :  { %v492_v25 = vpop.xlane.xlu0 %491 }
 0x2a2   :  { %v494_v26 = vsub.f32 %v481_v15, %v492_v25 }
 0x2a3   :  { %v1300_v27 = vpop.eup %1299 }
 0x2a4   :  { %v499_v28 = vpack.c.bf16 %v1300_v27, %v1300_v27  ;;  %v497_v29 = vmul.f32 1.442695, %v494_v26 }
 0x2a6   :  { %1301 = vpow2.f32 %v497_v29  ;;  %1057 = vmatmul.mubr.msk.bf16.vlgmr.msra.gmra.mxu0 %vm486_vm1, %v499_v28 }
 0x2a7   :  { %1183 = vmatprep.mubr.msk.bf16.mxu0 %vm1479_vm0, %v1478_v1  ;;  %1168 = vmatpush3.bf16.msra.mxu0 %v1275_v32 }
 0x2a8   :  { %1169 = vmatprep.subr.bf16.mxu0 %v1478_v1 }
 0x2ab   :  { %1170 = vmatpush3.bf16.msra.mxu0 %v1276_v33 }
 0x2ac   :  { %1171 = vmatprep.subr.bf16.mxu0 %v1478_v1 }
 0x2af   :  { %1172 = vmatpush3.bf16.msra.mxu0 %v1277_v34 }
 0x2b0   :  { %1173 = vmatprep.subr.bf16.mxu0 %v1478_v1 }
 0x2b3   :  { %v1302_v30 = vpop.eup %1301  ;;  %1174 = vmatpush3.bf16.msra.mxu0 %v1278_v35  ;;  %v1068_v35 = vld [vmem:[%s1669_s5 + $0x1] ss:$0 sm:$0xff] }
 0x2b4   :  { %v500_v31 = vpack.c.bf16 %v1302_v30, %v1302_v30  ;;  %1175 = vmatprep.subr.bf16.mxu0 %v1478_v1  ;;  %v1067_v30 = vld [vmem:[%s1669_s5] ss:$0 sm:$0xff] }
 0x2b6   :  { %1058 = vmatmul.mubr.msk.bf16.vlgmr.msra.gmra.mxu1 %vm486_vm1, %v500_v31 }
 0x2b7   :  { %1203 = vmatprep.mubr.msk.bf16.mxu1 %vm1479_vm0, %v1478_v1  ;;  %1176 = vmatpush3.bf16.msra.mxu0 %v1279_v36 }
 0x2b8   :  { %1177 = vmatprep.subr.bf16.mxu0 %v1478_v1 }
 0x2bb   :  { %1178 = vmatpush3.bf16.msra.mxu0 %v1280_v37 }
 0x2bc   :  { %1179 = vmatprep.subr.bf16.mxu0 %v1478_v1 }
 0x2bf   :  { %1180 = vmatpush3.bf16.msra.mxu0 %v1281_v38 }
 0x2c0   :  { %1181 = vmatprep.subr.bf16.mxu0 %v1478_v1 }
 0x2c3   :  { %1182 = vmatpush3.bf16.msra.mxu0 %v1282_v39 }
 0x2c4   :  { %1207 = vmatprep.subr.bf16.mxu0 %v1478_v1 }
 0x366   :  { %v538_v40 = vpop.f32.mrf.mxu0 }
 0x368   :  { %v540_v41 = vpop.f32.mrf.mxu0 }
 0x369   :  { %v589_v44 = vmax.f32 %v540_v41, 1e-12  ;;  %v1297_v41 = vld [vmem:[#allocation10 + $0x8] sm:$0xff]  }
 0x36a   :  { %v542_v42 = vpop.f32.mrf.mxu0 }
 0x36b   :  { %1303 = vrcp.f32 %v589_v44  ;;  %v1298_v42 = vld [vmem:[#allocation10] sm:$0xff]  }
 0x36c   :  { %v543_v43 = vpop.f32.mrf.mxu0 }
 0x36d   :  { %v1069_v43 = vld [vmem:[%s1669_s5 + $0x5] ss:$0 sm:$0xff] }
 0x376   :  { %v582_v45 = vpop.f32.mrf.mxu1 }
 0x378   :  { %v584_v46 = vpop.f32.mrf.mxu1  ;;  %v1304_v50 = vpop.eup %1303 }
 0x379   :  { %v590_v47 = vmax.f32 %v584_v46, 1e-12  ;;  %v593_v52 = vmul.f32 %v1304_v50, %v538_v40  ;;  %v1296_v40 = vld [vmem:[#allocation10 + $0x10] sm:$0xff]  }
 0x37a   :  { %v586_v48 = vpop.f32.mrf.mxu1 }
 0x37b   :  { %1305 = vrcp.f32 %v590_v47 }
 0x37c   :  { %v587_v49 = vpop.f32.mrf.mxu1 }
 0x388   :  { %v1306_v51 = vpop.eup %1305 }
 0x389   :  { %v594_v53 = vmul.f32 %v1306_v51, %v582_v45 }
 0x38b   :  { %v595_v54 = vpack.c.bf16 %v594_v53, %v593_v52 }
 0x38d   :  { %1184 = vmatmul.mubr.bf16.vlgmr.msra.gmra.mxu0 %v595_v54 }
 0x38e   :  { %1223 = vmatprep.mubr.msk.bf16.mxu0 %vm1479_vm0, %v1478_v1  ;;  %1208 = vmatpush3.bf16.msra.mxu0 %v1291_v7 }
 0x38f   :  { %1209 = vmatprep.subr.bf16.mxu0 %v1478_v1 }
 0x392   :  { %1210 = vmatpush3.bf16.msra.mxu0 %v1292_v8 }
 0x393   :  { %1211 = vmatprep.subr.bf16.mxu0 %v1478_v1 }
 0x396   :  { %1212 = vmatpush3.bf16.msra.mxu0 %v1293_v9 }
 0x397   :  { %1213 = vmatprep.subr.bf16.mxu0 %v1478_v1 }
 0x39a   :  { %1214 = vmatpush3.bf16.msra.mxu0 %v1294_v10 }
 0x39b   :  { %1215 = vmatprep.subr.bf16.mxu0 %v1478_v1 }
 0x39e   :  { %1216 = vmatpush3.bf16.msra.mxu0 %v1295_v11 }
 0x39f   :  { %1217 = vmatprep.subr.bf16.mxu0 %v1478_v1 }
 0x3a2   :  { %1218 = vmatpush3.bf16.msra.mxu0 %v1296_v40 }
 0x3a3   :  { %1219 = vmatprep.subr.bf16.mxu0 %v1478_v1 }
 0x3a6   :  { %1220 = vmatpush3.bf16.msra.mxu0 %v1297_v41 }
 0x3a7   :  { %1221 = vmatprep.subr.bf16.mxu0 %v1478_v1 }
 0x3aa   :  { %1222 = vmatpush3.bf16.msra.mxu0 %v1298_v42 }
 0x44d   :  { %v694_v55 = vpop.f32.mrf.mxu0 }
 0x44e   :  { %v1613_v56 = vadd.f32 %v694_v55, %v1566_v23  ;;  %v1283_v23 = vld [vmem:[#allocation8 + $0x38] sm:$0xff]  }
 0x44f   :  { %v1185_v57 = vpop.f32.mrf.mxu0  ;;  %1188 = vmatpush3.bf16.msra.mxu1 %v1283_v23 }
 0x450   :  { %709 = vadd.xlane.f32.xlu1 %v1613_v56  ;;  %v715_v58 = vmul.f32 %v1613_v56, %v1613_v56  ;;  %1189 = vmatprep.subr.bf16.mxu1 %v1478_v1 }
 0x451   :  { %v697_v59 = vpop.f32.mrf.mxu0 }
 0x452   :  { %v1619_v60 = vadd.f32 %v697_v59, %v1568_v24  ;;  %717 = vadd.xlane.f32.xlu0 %v715_v58  ;;  %v1286_v24 = vld [vmem:[#allocation8 + $0x20] sm:$0xff]  }
 0x453   :  { %v1186_v61 = vpop.f32.mrf.mxu0  ;;  %1190 = vmatpush3.bf16.msra.mxu1 %v1284_v63 }
 0x454   :  { %711 = vadd.xlane.f32.xlu1 %v1619_v60  ;;  %v716_v62 = vmul.f32 %v1619_v60, %v1619_v60  ;;  %1191 = vmatprep.subr.bf16.mxu1 %v1478_v1 }
 0x457   :  { %1192 = vmatpush3.bf16.msra.mxu1 %v1285_v2 }
 0x458   :  { %719 = vadd.xlane.f32.xlu1 %v716_v62  ;;  %1193 = vmatprep.subr.bf16.mxu1 %v1478_v1 }
 0x45b   :  { %1194 = vmatpush3.bf16.msra.mxu1 %v1286_v24 }
 0x45c   :  { %1195 = vmatprep.subr.bf16.mxu1 %v1478_v1 }
 0x45f   :  { %1196 = vmatpush3.bf16.msra.mxu1 %v1287_v3 }
 0x460   :  { %1197 = vmatprep.subr.bf16.mxu1 %v1478_v1 }
 0x463   :  { %1198 = vmatpush3.bf16.msra.mxu1 %v1288_v4 }
 0x464   :  { %1199 = vmatprep.subr.bf16.mxu1 %v1478_v1 }
 0x467   :  { %1200 = vmatpush3.bf16.msra.mxu1 %v1289_v5 }
 0x468   :  { %1201 = vmatprep.subr.bf16.mxu1 %v1478_v1  ;;  %v1078_v1 = vld [vmem:[%s1669_s5 + $0x4] ss:$0 sm:$0xff] }
 0x46b   :  { %1202 = vmatpush3.bf16.msra.mxu1 %v1290_v6 }
 0x4d9   :  { %v710_v12 = vpop.xlane.xlu1 %709 }
 0x4da   :  { %v713_v13 = vmul.f32 0.03125, %v710_v12 }
 0x4db   :  { %v718_v0 = vpop.xlane.xlu0 %717 }
 0x4dc   :  { %v723_v14 = vmul.f32 %v713_v13, %v713_v13  ;;  %v721_v15 = vmul.f32 0.03125, %v718_v0  ;;  %v727_v28 = vsub.f32 %v1613_v56, %v713_v13 }
 0x4dd   :  { %v712_v16 = vpop.xlane.xlu1 %711 }
 0x4de   :  { %v725_v17 = vsub.f32 %v721_v15, %v723_v14  ;;  %v714_v18 = vmul.f32 0.03125, %v712_v16  ;;  %v1087_v14 = vld [vmem:[%s1669_s5 + $0x2] ss:$0 sm:$0xff]  ;;  %v1088_v16 = vld [vmem:[%s1669_s5 + $0x3] ss:$0 sm:$0xff] }
 0x4e0   :  { %v729_v19 = vadd.f32 1e-05, %v725_v17  ;;  %v724_v21 = vmul.f32 %v714_v18, %v714_v18  ;;  %v728_v31 = vsub.f32 %v1619_v60, %v714_v18 }
 0x4e1   :  { %v720_v20 = vpop.xlane.xlu1 %719 }
 0x4e2   :  { %1307 = vrsqrt.f32 %v729_v19  ;;  %v722_v22 = vmul.f32 0.03125, %v720_v20 }
 0x4e4   :  { %v726_v25 = vsub.f32 %v722_v22, %v724_v21 }
 0x4e6   :  { %v730_v26 = vadd.f32 1e-05, %v726_v25 }
 0x4e8   :  { %1309 = vrsqrt.f32 %v730_v26 }
 0x4ef   :  { %v1308_v27 = vpop.eup %1307 }
 0x4f0   :  { %v733_v29 = vmul.f32 %v1308_v27, %v727_v28 }
 0x4f2   :  { %v739_v34 = vmul.f32 %v1067_v30, %v733_v29 }
 0x4f4   :  { %v745_v37 = vadd.f32 %v1068_v35, %v739_v34 }
 0x4f5   :  { %v1310_v32 = vpop.eup %1309 }
 0x4f6   :  { %v734_v33 = vmul.f32 %v1310_v32, %v728_v31 }
 0x4f8   :  { %v740_v36 = vmul.f32 %v1067_v30, %v734_v33 }
 0x4fa   :  { %v746_v38 = vadd.f32 %v1068_v35, %v740_v36 }
 0x4fc   :  { %v747_v39 = vpack.c.bf16 %v746_v38, %v745_v37 }
 0x4fe   :  { %1204 = vmatmul.mubr.bf16.vlgmr.msra.gmra.mxu1 %v747_v39 }
 0x5be   :  { %v850_v44 = vpop.f32.mrf.mxu1 }
 0x5bf   :  { %v851_v46 = vadd.f32 %v1069_v43, %v850_v44 }
 0x5c0   :  { %v1205_v45 = vpop.f32.mrf.mxu1 }
 0x5c1   :  { %v857_v50 = vmax.f32 %v851_v46, 0.0 }
 0x5c2   :  { %v853_v47 = vpop.f32.mrf.mxu1 }
 0x5c3   :  { %v854_v48 = vadd.f32 %v1069_v43, %v853_v47 }
 0x5c4   :  { %v1206_v49 = vpop.f32.mrf.mxu1 }
 0x5c5   :  { %v858_v51 = vmax.f32 %v854_v48, 0.0 }
 0x5c7   :  { %v859_v52 = vpack.c.bf16 %v858_v51, %v857_v50 }
 0x5c9   :  { %1224 = vmatmul.mubr.bf16.vlgmr.msra.gmra.mxu0 %v859_v52 }
 0x689   :  { %v962_v53 = vpop.f32.mrf.mxu0 }
 0x68a   :  { %v963_v54 = vadd.f32 %v1078_v1, %v962_v53 }
 0x68b   :  { %v1225_v55 = vpop.f32.mrf.mxu0 }
 0x68c   :  { %v969_v56 = vadd.f32 %v963_v54, %v745_v37 }
 0x68d   :  { %v965_v57 = vpop.f32.mrf.mxu0 }
 0x68e   :  { %v966_v58 = vadd.f32 %v1078_v1, %v965_v57  ;;  %971 = vadd.xlane.f32.xlu0 %v969_v56  ;;  %v977_v61 = vmul.f32 %v969_v56, %v969_v56 }
 0x68f   :  { %v1226_v59 = vpop.f32.mrf.mxu0 }
 0x690   :  { %v970_v60 = vadd.f32 %v966_v58, %v746_v38 }
 0x692   :  { %979 = vadd.xlane.f32.xlu0 %v977_v61  ;;  %973 = vadd.xlane.f32.xlu1 %v970_v60  ;;  %v978_v62 = vmul.f32 %v970_v60, %v970_v60 }
 0x696   :  { %981 = vadd.xlane.f32.xlu1 %v978_v62 }
 0x717   :  { %v972_v23 = vpop.xlane.xlu0 %971 }
 0x718   :  { %v975_v63 = vmul.f32 0.03125, %v972_v23 }
 0x71a   :  { %v985_v3 = vmul.f32 %v975_v63, %v975_v63  ;;  %v989_v13 = vsub.f32 %v969_v56, %v975_v63 }
 0x71b   :  { %v980_v2 = vpop.xlane.xlu0 %979  ;;  %v974_v24 = vpop.xlane.xlu1 %973 }
 0x71c   :  { %v983_v4 = vmul.f32 0.03125, %v980_v2  ;;  %v976_v5 = vmul.f32 0.03125, %v974_v24 }
 0x71e   :  { %v987_v6 = vsub.f32 %v983_v4, %v985_v3  ;;  %v986_v9 = vmul.f32 %v976_v5, %v976_v5  ;;  %v990_v17 = vsub.f32 %v970_v60, %v976_v5 }
 0x71f   :  { %v982_v7 = vpop.xlane.xlu1 %981 }
 0x720   :  { %v991_v8 = vadd.f32 1e-05, %v987_v6  ;;  %v984_v10 = vmul.f32 0.03125, %v982_v7 }
 0x722   :  { %1311 = vrsqrt.f32 %v991_v8  ;;  %v988_v11 = vsub.f32 %v984_v10, %v986_v9 }
 0x724   :  { %v992_v12 = vadd.f32 1e-05, %v988_v11 }
 0x726   :  { %1313 = vrsqrt.f32 %v992_v12 }
 0x72f   :  { %v1312_v0 = vpop.eup %1311 }
 0x730   :  { %v995_v15 = vmul.f32 %v1312_v0, %v989_v13 }
 0x732   :  { %v1001_v18 = vmul.f32 %v1087_v14, %v995_v15 }
 0x733   :  { %v1314_v19 = vpop.eup %1313 }
 0x734   :  { %v996_v20 = vmul.f32 %v1314_v19, %v990_v17  ;;  %v1007_v21 = vadd.f32 %v1088_v16, %v1001_v18 }
 0x736   :  { %v1002_v22 = vmul.f32 %v1087_v14, %v996_v20  ;;  %1009 = vst [vmem:[#allocation13] sm:$0xff] %v1007_v21 }
 0x738   :  { %v1008_v25 = vadd.f32 %v1088_v16, %v1002_v22 }
 0x73a   :  { %1010 = vst [vmem:[#allocation13 + $0x8] sm:$0xff] %v1008_v25 }
 0x73b   :  { %1446 = shalt.err (!%p1443_p6)
}
 0x73c   :  { %1022 = dma.vmem_to_hbm [thread:$0]  %s1017_s29, 256, %s1672_s8, [#allocation4], %s1472_s21, %s1472_s21, %s1473_s22  }
 0x73d   :  { %1463 = dma.done.wait [#allocation4], 256  }
 0x73e   :  { %1464 = vsyncadd [#allocation4], 4294967040 }
 0x73f   :  { %1026 = vsyncpa [#allocation3], 1 }
 0x740   :  { %1027 = vsyncpa [#allocation6], 1 }
 0x741   :  { %1028 = vsyncpa [#allocation9], 1 }
 0x742   :  { %1029 = vsyncpa [#allocation12], 1 }
 0x743   :  { %1030 = vsyncpa [#allocation4], 1 }

</bundles_post_ra>
